<compile_context>
chip_gen: v6e
topology: v6e:2x2x1
jax: 0.10.0
libtpu: 0.0.40
codegen_flags: <defaults>
</compile_context>

<pallas_src>
import functools

import jax
import jax.numpy as jnp
from jax.experimental import pallas as pl
from jax.experimental.pallas import tpu as pltpu

NEG_SLOPE = 0.01     # nn.LeakyReLU default
BN_EPS = 1e-5        # nn.BatchNorm1d default
NEG_MASK = -1e30     # bias for padded output lanes -> exp() == 0, no NaN


def _round_up(x, m):
    return (x + m - 1) // m * m


def _device_kind():
    try:
        return jax.devices()[0].device_kind.lower()
    except Exception:
        return ""


def _feature_pad_granularity():
    """Pad feature dims to 256 on v6e/v7x (2x256^2 MXU), 128 otherwise."""
    kind = _device_kind()
    if "v6" in kind or "v7" in kind:
        return 256
    return 128


def _vmem_cap_bytes():
    """~75% of physical per-core VMEM; conservative fallback works on all gens."""
    try:
        return int(pltpu.get_tpu_info().vmem_capacity_bytes) * 3 // 4
    except Exception:
        return 48 << 20


def _mlp_kernel(x_ref, w1_ref, b1_ref, w3_ref, b3_ref, out_ref):
    # ---- linear1 (+ folded bn1): bf16 operands, f32 accumulate (MXU) ----
    h = jnp.dot(x_ref[...], w1_ref[...],
                preferred_element_type=jnp.float32) + b1_ref[...]

    # ---- LeakyReLU (slope 0.01): one vmul + one vmax on the VPU ----
    h = jnp.maximum(h, NEG_SLOPE * h)

    # ---- dropout1: identity in inference mode ----

    # ---- linear3: bf16 operands, f32 accumulate (MXU) ----
    logits = jnp.dot(h.astype(jnp.bfloat16), w3_ref[...],
                     preferred_element_type=jnp.float32) + b3_ref[...]
    # padded output lanes carry bias == -1e30 -> exp() underflows to exactly 0

    # ---- softmax over last dim (f32, max-subtracted, exact normalization) ----
    m = jnp.max(logits, axis=-1, keepdims=True)
    e = jnp.exp(logits - m)
    denom = jnp.sum(e, axis=-1, keepdims=True)
    out_ref[...] = (e / denom).astype(out_ref.dtype)


def mlp_forward(x, params, *, block_b=512):
    """x: [B, num_i] float32. params: dict of weights (see init_params)."""
    B, num_i = x.shape
    w1, b1 = params["w1"], params["b1"]
    w3, b3 = params["w3"], params["b3"]
    gamma, beta = params["gamma"], params["beta"]
    mean, var = params["mean"], params["var"]
    num_h = w1.shape[1]
    num_o = w3.shape[1]

    # ---- fold BatchNorm1d (inference) into linear1 (runs once in XLA) ----
    scale = gamma * jax.lax.rsqrt(var + BN_EPS)          # [num_h]
    w1f = (w1 * scale[None, :]).astype(jnp.bfloat16)     # [num_i, num_h]
    b1f = ((b1 - mean) * scale + beta).astype(jnp.float32)

    # ---- pad feature dims (gen-aware granularity), batch to bf16 sublanes ----
    fpad = _feature_pad_granularity()
    Ki = _round_up(num_i, fpad)
    H = _round_up(num_h, fpad)
    O = _round_up(num_o, fpad)

    Bp0 = _round_up(B, 16)                 # bf16 sublanes pack in pairs
    tb = min(_round_up(block_b, 16), Bp0)
    # Ensure >= 4 grid steps for medium/large batches: dual-TC sharding on v7x
    # + BlockSpec DMA/compute overlap everywhere.
    if Bp0 >= 64 and Bp0 // tb < 4:
        tb = _round_up(-(-Bp0 // 4), 16)
    Bp = _round_up(Bp0, tb)
    n_blocks = Bp // tb

    # ---- build (possibly padded) operands; skip copies when already aligned ----
    xp = x.astype(jnp.bfloat16)
    if (Bp != B) or (Ki != num_i):
        xp = jnp.zeros((Bp, Ki), jnp.bfloat16).at[:B, :num_i].set(xp)

    if (Ki != num_i) or (H != num_h):
        w1p = jnp.zeros((Ki, H), jnp.bfloat16).at[:num_i, :num_h].set(w1f)
    else:
        w1p = w1f
    if H != num_h:
        b1p = jnp.zeros((1, H), jnp.float32).at[0, :num_h].set(b1f)
    else:
        b1p = b1f.reshape(1, H)

    w3c = w3.astype(jnp.bfloat16)
    if (H != num_h) or (O != num_o):
        w3p = jnp.zeros((H, O), jnp.bfloat16).at[:num_h, :num_o].set(w3c)
    else:
        w3p = w3c
    if O != num_o:
        b3p = jnp.full((1, O), NEG_MASK, jnp.float32).at[0, :num_o].set(
            b3.astype(jnp.float32))
    else:
        b3p = b3.astype(jnp.float32).reshape(1, O)

    # ---- honest VMEM budget (pipelines + double-buffered params + temporaries) ----
    out_bytes = 4
    vmem_bytes = (
        2 * tb * Ki * 2                                   # x pipeline (bf16, 2 bufs)
        + 2 * tb * O * out_bytes                          # out pipeline (2 bufs)
        + 2 * (Ki * H * 2 + H * 4 + H * O * 2 + O * 4)    # params (Pallas double-buffers)
        + tb * H * 4 + tb * H * 2                         # h f32 + h bf16
        + 2 * tb * O * 4                                  # logits / e f32
        + (2 << 20)                                       # slack
    )
    vmem_bytes = min(max(vmem_bytes, 8 << 20), _vmem_cap_bytes())

    cost = pl.CostEstimate(
        flops=2 * Bp * (Ki * H + H * O),
        transcendentals=Bp * O,
        bytes_accessed=(xp.size * 2 + w1p.size * 2 + b1p.size * 4
                        + w3p.size * 2 + b3p.size * 4 + Bp * O * out_bytes),
    )

    out_padded = pl.pallas_call(
        _mlp_kernel,
        out_shape=jax.ShapeDtypeStruct((Bp, O), jnp.float32),
        grid_spec=pltpu.PrefetchScalarGridSpec(
            num_scalar_prefetch=0,
            grid=(n_blocks,),
            in_specs=[
                pl.BlockSpec((tb, Ki), lambda i: (i, 0)),   # x        (tiled)
                pl.BlockSpec((Ki, H), lambda i: (0, 0)),    # w1'      (resident)
                pl.BlockSpec((1, H), lambda i: (0, 0)),     # b1'      (resident)
                pl.BlockSpec((H, O), lambda i: (0, 0)),     # w3       (resident)
                pl.BlockSpec((1, O), lambda i: (0, 0)),     # b3+mask  (resident)
            ],
            out_specs=pl.BlockSpec((tb, O), lambda i: (i, 0)),
        ),
        compiler_params=pltpu.CompilerParams(
            dimension_semantics=("parallel",),
            vmem_limit_bytes=int(vmem_bytes),
        ),
        cost_estimate=cost,
    )(xp, w1p, b1p, w3p, b3p)

    if (Bp != B) or (O != num_o):
        return out_padded[:B, :num_o]
    return out_padded


def init_params(key, num_i, num_h, num_o):
    """Deterministic PyTorch-style init (uniform(-1/sqrt(fan_in), 1/sqrt(fan_in)))."""
    k1, k2, k3, k4 = jax.random.split(key, 4)
    bound1 = 1.0 / jnp.sqrt(num_i)
    bound3 = 1.0 / jnp.sqrt(num_h)
    return {
        # stored as [in, out] (transposed relative to torch's [out, in])
        "w1": jax.random.uniform(k1, (num_i, num_h), jnp.float32, -bound1, bound1),
        "b1": jax.random.uniform(k2, (num_h,), jnp.float32, -bound1, bound1),
        "w3": jax.random.uniform(k3, (num_h, num_o), jnp.float32, -bound3, bound3),
        "b3": jax.random.uniform(k4, (num_o,), jnp.float32, -bound3, bound3),
        # BatchNorm1d init: gamma=1, beta=0, running_mean=0, running_var=1
        "gamma": jnp.ones((num_h,), jnp.float32),
        "beta": jnp.zeros((num_h,), jnp.float32),
        "mean": jnp.zeros((num_h,), jnp.float32),
        "var": jnp.ones((num_h,), jnp.float32),
    }


def reference_forward(x, p):
    """Pure-JAX f32 reference of the PyTorch forward (inference mode)."""
    h = x @ p["w1"] + p["b1"][None, :]
    h = (h - p["mean"]) / jnp.sqrt(p["var"] + BN_EPS) * p["gamma"] + p["beta"]
    h = jnp.where(h >= 0, h, NEG_SLOPE * h)
    logits = h @ p["w3"] + p["b3"][None, :]
    return jax.nn.softmax(logits, axis=-1)


if __name__ == "__main__":
    B, num_i, num_h, num_o = 8, 32, 64, 16
    key = jax.random.PRNGKey(0)
    kx, kp = jax.random.split(key)
    x = jax.random.normal(kx, (B, num_i), jnp.float32)
    params = init_params(kp, num_i, num_h, num_o)

    fwd = jax.jit(functools.partial(mlp_forward, block_b=512))
    out = jax.block_until_ready(fwd(x, params))

    ref = reference_forward(x, params)
    assert out.shape == (B, num_o), out.shape
    # bf16 matmul operands -> relaxed tolerance vs the f32 reference
    assert jnp.allclose(out, ref, atol=2e-2, rtol=2e-2), "mismatch vs reference"
    # exact f32 normalization in-kernel -> row sums are 1 to f32 precision
    assert jnp.allclose(jnp.sum(out, axis=-1), 1.0, atol=1e-3), \
        "softmax rows must sum to 1"

    print("KERNEL_OK")
</pallas_src>

<mosaic_0001>
module attributes {stable_mosaic.version = 11 : i64} {
  func.func @_mlp_kernel(%arg0: i32, %arg1: memref<16x128xbf16, #tpu.memory_space<vmem>>, %arg2: memref<128x128xbf16, #tpu.memory_space<vmem>>, %arg3: memref<1x128xf32, #tpu.memory_space<vmem>>, %arg4: memref<128x128xbf16, #tpu.memory_space<vmem>>, %arg5: memref<1x128xf32, #tpu.memory_space<vmem>>, %arg6: memref<16x128xf32, #tpu.memory_space<vmem>>) attributes {dimension_semantics = [#tpu.dimension_semantics<parallel>], iteration_bounds = array<i64: 1>, scalar_prefetch = 0 : i64, scratch_operands = 0 : i64, tpu.core_type = #tpu.core_type<tc>, window_params = [{transform_indices = @transform_0, window_bounds = array<i64: 16, 128>}, {pipeline_mode = #tpu.pipeline_mode<synchronous>, transform_indices = @transform_1, window_bounds = array<i64: 128, 128>}, {pipeline_mode = #tpu.pipeline_mode<synchronous>, transform_indices = @transform_2, window_bounds = array<i64: 1, 128>}, {pipeline_mode = #tpu.pipeline_mode<synchronous>, transform_indices = @transform_3, window_bounds = array<i64: 128, 128>}, {pipeline_mode = #tpu.pipeline_mode<synchronous>, transform_indices = @transform_4, window_bounds = array<i64: 1, 128>}, {transform_indices = @transform_5, window_bounds = array<i64: 16, 128>}]} {
    %c0 = arith.constant 0 : index
    %c0_0 = arith.constant 0 : index
    %0 = vector.load %arg1[%c0, %c0_0] : memref<16x128xbf16, #tpu.memory_space<vmem>>, vector<16x128xbf16>
    %c0_1 = arith.constant 0 : index
    %c0_2 = arith.constant 0 : index
    %1 = vector.load %arg2[%c0_1, %c0_2] : memref<128x128xbf16, #tpu.memory_space<vmem>>, vector<128x128xbf16>
    %cst = arith.constant dense<0.000000e+00> : vector<16x128xf32>
    %2 = tpu.matmul %0, %1, %cst {dimension_numbers = #tpu.dot_dimension_numbers<[1], [0], [0], [1], [0, 0, 1, 1], [], []>} : vector<16x128xbf16>, vector<128x128xbf16>, vector<16x128xf32> -> vector<16x128xf32>
    %c0_3 = arith.constant 0 : index
    %c0_4 = arith.constant 0 : index
    %3 = vector.load %arg3[%c0_3, %c0_4] : memref<1x128xf32, #tpu.memory_space<vmem>>, vector<1x128xf32>
    %4 = vector.broadcast %3 : vector<1x128xf32> to vector<16x128xf32>
    %5 = arith.addf %2, %4 : vector<16x128xf32>
    %cst_5 = arith.constant 0.00999999977 : f32
    %6 = vector.broadcast %cst_5 : f32 to vector<16x128xf32>
    %7 = arith.mulf %6, %5 : vector<16x128xf32>
    %8 = arith.maximumf %5, %7 : vector<16x128xf32>
    %9 = arith.truncf %8 : vector<16x128xf32> to vector<16x128xbf16>
    %c0_6 = arith.constant 0 : index
    %c0_7 = arith.constant 0 : index
    %10 = vector.load %arg4[%c0_6, %c0_7] : memref<128x128xbf16, #tpu.memory_space<vmem>>, vector<128x128xbf16>
    %cst_8 = arith.constant dense<0.000000e+00> : vector<16x128xf32>
    %11 = tpu.matmul %9, %10, %cst_8 {dimension_numbers = #tpu.dot_dimension_numbers<[1], [0], [0], [1], [0, 0, 1, 1], [], []>} : vector<16x128xbf16>, vector<128x128xbf16>, vector<16x128xf32> -> vector<16x128xf32>
    %c0_9 = arith.constant 0 : index
    %c0_10 = arith.constant 0 : index
    %12 = vector.load %arg5[%c0_9, %c0_10] : memref<1x128xf32, #tpu.memory_space<vmem>>, vector<1x128xf32>
    %13 = vector.broadcast %12 : vector<1x128xf32> to vector<16x128xf32>
    %14 = arith.addf %11, %13 : vector<16x128xf32>
    %cst_11 = arith.constant dense<0xFF800000> : vector<16xf32>
    %15 = vector.multi_reduction <maximumf>, %14, %cst_11 [1] : vector<16x128xf32> to vector<16xf32>
    %16 = vector.shape_cast %15 : vector<16xf32> to vector<16x1xf32>
    %17 = vector.broadcast %16 : vector<16x1xf32> to vector<16x128xf32>
    %18 = arith.subf %14, %17 : vector<16x128xf32>
    %19 = math.exp %18 : vector<16x128xf32>
    %cst_12 = arith.constant dense<0.000000e+00> : vector<16xf32>
    %20 = vector.multi_reduction <add>, %19, %cst_12 [1] : vector<16x128xf32> to vector<16xf32>
    %21 = vector.shape_cast %20 : vector<16xf32> to vector<16x1xf32>
    %22 = vector.broadcast %21 : vector<16x1xf32> to vector<16x128xf32>
    %23 = arith.divf %19, %22 : vector<16x128xf32>
    %c0_13 = arith.constant 0 : index
    %c0_14 = arith.constant 0 : index
    %24 = vector.load %arg6[%c0_13, %c0_14] : memref<16x128xf32, #tpu.memory_space<vmem>>, vector<16x128xf32>
    tpu.vector_store %arg6[%c0_13, %c0_14], %23 {strides = array<i32>} : memref<16x128xf32, #tpu.memory_space<vmem>>, vector<16x128xf32>,
    return
  }
  func.func @transform_0(%arg0: i32) -> (i32, i32) {
    %c0_i32 = arith.constant 0 : i32
    %c0_i32_0 = arith.constant 0 : i32
    return %arg0, %c0_i32 : i32, i32
  }
  func.func @transform_1(%arg0: i32) -> (i32, i32) {
    %c0_i32 = arith.constant 0 : i32
    %c0_i32_0 = arith.constant 0 : i32
    %c0_i32_1 = arith.constant 0 : i32
    return %c0_i32, %c0_i32_0 : i32, i32
  }
  func.func @transform_2(%arg0: i32) -> (i32, i32) {
    %c0_i32 = arith.constant 0 : i32
    %c0_i32_0 = arith.constant 0 : i32
    %c0_i32_1 = arith.constant 0 : i32
    return %c0_i32, %c0_i32_0 : i32, i32
  }
  func.func @transform_3(%arg0: i32) -> (i32, i32) {
    %c0_i32 = arith.constant 0 : i32
    %c0_i32_0 = arith.constant 0 : i32
    %c0_i32_1 = arith.constant 0 : i32
    return %c0_i32, %c0_i32_0 : i32, i32
  }
  func.func @transform_4(%arg0: i32) -> (i32, i32) {
    %c0_i32 = arith.constant 0 : i32
    %c0_i32_0 = arith.constant 0 : i32
    %c0_i32_1 = arith.constant 0 : i32
    return %c0_i32, %c0_i32_0 : i32, i32
  }
  func.func @transform_5(%arg0: i32) -> (i32, i32) {
    %c0_i32 = arith.constant 0 : i32
    %c0_i32_0 = arith.constant 0 : i32
    return %arg0, %c0_i32 : i32, i32
  }
}

</mosaic_0001>

<bundles_post_ra>
// kernel: mlp_forward.1
= control target key start
LH: loop header
LB: loop body
LE: loop exit
PB: predicated region body
PF: predicated region fallthrough
CT: control target
= control target key end

     0   :  { %v386_v0 = vmov 0.0   ;;  %vm387_vm0 = vmmov 0   ;;  %s481_s1 = inlined_call_operand.vmem [shape: bf16[128,128], index: 1, kind: input, shape index: {}]   ;;  %s482_s3 = inlined_call_operand.vmem [shape: bf16[128,128], index: 3, kind: input, shape index: {}]   ;;  %s483_s0 = inlined_call_operand.vmem [shape: bf16[16,128], index: 0, kind: input, shape index: {}]   ;;  %s484_s2 = inlined_call_operand.vmem [shape: f32[1,128], index: 2, kind: input, shape index: {}]   ;;  %s485_s4 = inlined_call_operand.vmem [shape: f32[1,128], index: 4, kind: input, shape index: {}]   ;;  %s486_s5 = inlined_call_operand.vmem [shape: f32[16,128], index: 5, kind: output, shape index: {}]  }
   0x1   :  { %319 = vmatprep.subr.bf16.mxu0 %v386_v0  ;;  %v361_v1 = vld [vmem:[%s481_s1 + $0x38] sm:$0xff]   ;;  %335 = vmatprep.mubr.msk.bf16.mxu0 %vm387_vm0, %v386_v0  ;;  %v362_v2 = vld [vmem:[%s481_s1 + $0x30] sm:$0xff]   ;;  %v363_v3 = vld [vmem:[%s481_s1 + $0x28] sm:$0xff]  }
   0x2   :  { %339 = vmatprep.subr.bf16.mxu1 %v386_v0  ;;  %355 = vmatprep.mubr.msk.bf16.mxu1 %vm387_vm0, %v386_v0  ;;  %v370_v4 = vld [vmem:[%s482_s3 + $0x38] sm:$0xff]   ;;  %v364_v5 = vld [vmem:[%s481_s1 + $0x20] sm:$0xff]   ;;  %v371_v6 = vld [vmem:[%s482_s3 + $0x30] sm:$0xff]  }
   0x3   :  { %320 = vmatpush3.bf16.msra.mxu0 %v361_v1  ;;  %340 = vmatpush3.bf16.msra.mxu1 %v370_v4  ;;  %v365_v7 = vld [vmem:[%s481_s1 + $0x18] sm:$0xff]   ;;  %v372_v8 = vld [vmem:[%s482_s3 + $0x28] sm:$0xff]   ;;  %v366_v9 = vld [vmem:[%s481_s1 + $0x10] sm:$0xff]  }
   0x4   :  { %321 = vmatprep.subr.bf16.mxu0 %v386_v0  ;;  %341 = vmatprep.subr.bf16.mxu1 %v386_v0  ;;  %v373_v10 = vld [vmem:[%s482_s3 + $0x20] sm:$0xff]   ;;  %v367_v11 = vld [vmem:[%s481_s1 + $0x8] sm:$0xff]   ;;  %v374_v12 = vld [vmem:[%s482_s3 + $0x18] sm:$0xff]  }
   0x5   :  { %v368_v13 = vld [vmem:[%s481_s1] sm:$0xff]   ;;  %v375_v15 = vld [vmem:[%s482_s3 + $0x10] sm:$0xff]   ;;  %v376_v16 = vld [vmem:[%s482_s3 + $0x8] sm:$0xff]  }
   0x6   :  { %v369_v14 = vld [vmem:[%s483_s0] sm:$0xff]  }
   0x7   :  { %322 = vmatpush3.bf16.msra.mxu0 %v362_v2  ;;  %342 = vmatpush3.bf16.msra.mxu1 %v371_v6  ;;  %v377_v17 = vld [vmem:[%s482_s3] sm:$0xff]  }
   0x8   :  { %323 = vmatprep.subr.bf16.mxu0 %v386_v0  ;;  %343 = vmatprep.subr.bf16.mxu1 %v386_v0  ;;  %v282_v18 = vld [vmem:[%s484_s2] ss:$0 sm:$0xff] }
   0x9   :  { %v292_v30 = vld [vmem:[%s485_s4] ss:$0 sm:$0xff] }
   0xb   :  { %324 = vmatpush3.bf16.msra.mxu0 %v363_v3  ;;  %344 = vmatpush3.bf16.msra.mxu1 %v372_v8 }
   0xc   :  { %325 = vmatprep.subr.bf16.mxu0 %v386_v0  ;;  %345 = vmatprep.subr.bf16.mxu1 %v386_v0 }
   0xf   :  { %326 = vmatpush3.bf16.msra.mxu0 %v364_v5  ;;  %346 = vmatpush3.bf16.msra.mxu1 %v373_v10 }
  0x10   :  { %327 = vmatprep.subr.bf16.mxu0 %v386_v0  ;;  %347 = vmatprep.subr.bf16.mxu1 %v386_v0 }
  0x13   :  { %328 = vmatpush3.bf16.msra.mxu0 %v365_v7  ;;  %348 = vmatpush3.bf16.msra.mxu1 %v374_v12 }
  0x14   :  { %329 = vmatprep.subr.bf16.mxu0 %v386_v0  ;;  %349 = vmatprep.subr.bf16.mxu1 %v386_v0 }
  0x17   :  { %330 = vmatpush3.bf16.msra.mxu0 %v366_v9  ;;  %350 = vmatpush3.bf16.msra.mxu1 %v375_v15 }
  0x18   :  { %331 = vmatprep.subr.bf16.mxu0 %v386_v0  ;;  %351 = vmatprep.subr.bf16.mxu1 %v386_v0 }
  0x1b   :  { %332 = vmatpush3.bf16.msra.mxu0 %v367_v11  ;;  %352 = vmatpush3.bf16.msra.mxu1 %v376_v16 }
  0x1c   :  { %333 = vmatprep.subr.bf16.mxu0 %v386_v0  ;;  %353 = vmatprep.subr.bf16.mxu1 %v386_v0 }
  0x1f   :  { %334 = vmatpush3.bf16.msra.mxu0 %v368_v13  ;;  %354 = vmatpush3.bf16.msra.mxu1 %v377_v17 }
  0x22   :  { %336 = vmatmul.mubr.bf16.vlgmr.msra.gmra.mxu0 %v369_v14 }
  0xe2   :  { %v134_v19 = vpop.f32.mrf.mxu0 }
  0xe3   :  { %v135_v20 = vadd.f32 %v282_v18, %v134_v19 }
  0xe4   :  { %v337_v21 = vpop.f32.mrf.mxu0 }
  0xe5   :  { %v141_v23 = vmul.f32 0.01, %v135_v20 }
  0xe6   :  { %v137_v22 = vpop.f32.mrf.mxu0 }
  0xe7   :  { %v138_v24 = vadd.f32 %v282_v18, %v137_v22  ;;  %v143_v27 = vmax.f32 %v135_v20, %v141_v23 }
  0xe8   :  { %v338_v25 = vpop.f32.mrf.mxu0 }
  0xe9   :  { %v142_v26 = vmul.f32 0.01, %v138_v24 }
  0xeb   :  { %v144_v28 = vmax.f32 %v138_v24, %v142_v26 }
  0xed   :  { %v145_v29 = vpack.c.bf16 %v144_v28, %v143_v27 }
  0xef   :  { %356 = vmatmul.mubr.bf16.vlgmr.msra.gmra.mxu1 %v145_v29 }
 0x1af   :  { %v251_v31 = vpop.f32.mrf.mxu1 }
 0x1b0   :  { %v252_v32 = vadd.f32 %v292_v30, %v251_v31 }
 0x1b1   :  { %v357_v33 = vpop.f32.mrf.mxu1 }
 0x1b2   :  { %258 = vmax.xlane.f32.xlu0 %v252_v32 }
 0x1b3   :  { %v254_v34 = vpop.f32.mrf.mxu1 }
 0x1b4   :  { %v255_v35 = vadd.f32 %v292_v30, %v254_v34 }
 0x1b5   :  { %v358_v36 = vpop.f32.mrf.mxu1 }
 0x1b6   :  { %260 = vmax.xlane.f32.xlu0 %v255_v35 }
 0x23b   :  { %v259_v37 = vpop.xlane.xlu0 %258 }
 0x23c   :  { %v262_v38 = vsub.f32 %v252_v32, %v259_v37 }
 0x23e   :  { %v264_v39 = vmul.f32 1.442695, %v262_v38 }
 0x23f   :  { %v261_v40 = vpop.xlane.xlu0 %260 }
 0x240   :  { %378 = vpow2.f32 %v264_v39  ;;  %v263_v41 = vsub.f32 %v255_v35, %v261_v40 }
 0x242   :  { %v266_v42 = vmul.f32 1.442695, %v263_v41 }
 0x244   :  { %380 = vpow2.f32 %v266_v42 }
 0x24d   :  { %v379_v43 = vpop.eup %378 }
 0x24e   :  { %268 = vadd.xlane.f32.xlu1 %v379_v43 }
 0x251   :  { %v381_v44 = vpop.eup %380 }
 0x252   :  { %270 = vadd.xlane.f32.xlu1 %v381_v44 }
 0x2d7   :  { %v269_v45 = vpop.xlane.xlu1 %268 }
 0x2d8   :  { %382 = vrcp.f32 %v269_v45 }
 0x2db   :  { %v271_v46 = vpop.xlane.xlu1 %270 }
 0x2dc   :  { %384 = vrcp.f32 %v271_v46 }
 0x2e5   :  { %v383_v47 = vpop.eup %382 }
 0x2e6   :  { %v273_v48 = vmul.f32 %v383_v47, %v379_v43 }
 0x2e8   :  { %276 = vst [vmem:[%s486_s5] sm:$0xff] %v273_v48 }
 0x2e9   :  { %v385_v49 = vpop.eup %384 }
 0x2ea   :  { %v275_v50 = vmul.f32 %v385_v49, %v381_v44 }
 0x2ec   :  { %277 = vst [vmem:[%s486_s5 + $0x8] sm:$0xff] %v275_v50 }

</bundles_post_ra>
